<compile_context>
chip_gen: v7x
topology: tpu7x:2x2x1
jax: 0.10.0
libtpu: 0.0.40
codegen_flags: <defaults>
</compile_context>

<pallas_src>
import jax
import jax.numpy as jnp
import numpy as np
from jax.experimental import pallas as pl
from jax.experimental.pallas import tpu as pltpu


def conv_relu_kernel(x_ref, t_ref, b_ref, o_ref):
    """One grid step: all H output rows of `nb` batches in three accumulating MXU dots.

    x_ref: (nb, H+2, (W+2)*Cin)   zero-haloed, lane-flattened input (compute dtype)
    t_ref: (3, (W+2)*Cin, W*Cout) per-kernel-row block-Toeplitz weights (compute dtype)
    b_ref: (1, W*Cout)            bias tiled along W (f32)
    o_ref: (nb, H, W*Cout)        lane-dense output block (f32)
    """
    nb, h, wcout = o_ref.shape

    def lhs(dy):
        # Height-shifted row window for kernel tap row dy, sublane-stacked over the
        # batches of this block so the MXU sees M = nb * H rows per dot.
        rows = [x_ref[b, pl.ds(dy, h), :] for b in range(nb)]
        return rows[0] if nb == 1 else jnp.concatenate(rows, axis=0)

    # Three accumulating K = (W+2)*Cin contractions (one per kernel row) -- replaces the
    # previous single dot over an unaligned 3x72-lane concatenation.  f32 accumulator.
    acc = jnp.dot(lhs(0), t_ref[0], preferred_element_type=jnp.float32)
    acc += jnp.dot(lhs(1), t_ref[1], preferred_element_type=jnp.float32)
    acc += jnp.dot(lhs(2), t_ref[2], preferred_element_type=jnp.float32)

    out = jnp.maximum(acc + b_ref[...], 0.0)          # bias + ReLU in f32
    # Lane-dense store: last dim W*Cout (= 128 here) -> unmasked full-width vst.
    o_ref[...] = out.reshape(o_ref.shape).astype(o_ref.dtype)


def conv_relu(x_nchw, weight, bias, *, compute_dtype=jnp.bfloat16,
              target_rows_per_step=256):
    """3x3 conv, padding=1, + bias + ReLU.

    x_nchw: (N, Cin, H, W); weight: (Cout, Cin, 3, 3); bias: (Cout,).  Returns NCHW f32.
    """
    N, Cin, H, W = x_nchw.shape
    Cout = weight.shape[0]
    assert weight.shape == (Cout, Cin, 3, 3)
    Hp, Wp = H + 2, W + 2

    # Batches folded per grid step: raise M = nb*H toward ~target_rows_per_step while
    # keeping >= 2 parallel grid steps when N allows (v7x has 2 TensorCores; v5e/v6e are
    # single-TC so bigger/fewer steps are strictly fine there).
    nb = min(N, max(1, target_rows_per_step // H), max(1, (N + 1) // 2))
    while N % nb:
        nb -= 1
    n_steps = N // nb

    # NCHW -> NHWC -> 1-px zero halo -> flatten (w, c) into the lane axis; cast to the
    # MXU-native compute dtype (bf16 in, f32 accumulate).  XLA fuses these into one pass.
    x_nhwc = jnp.transpose(x_nchw, (0, 2, 3, 1))
    x_pad = jnp.pad(x_nhwc, ((0, 0), (1, 1), (1, 1), (0, 0)))
    x_flat = x_pad.reshape(N, Hp, Wp * Cin).astype(compute_dtype)

    # Per-kernel-row block-Toeplitz weights:
    #   T[dy, wx*Cin + ci, w*Cout + co] = weight[co, ci, dy, wx - w]  if 0 <= wx-w <= 2 else 0
    # so out[y, w*Cout + co] = sum_dy  x_pad[y+dy, :, :]_flat  .  T[dy].
    w_taps = jnp.transpose(weight, (2, 3, 1, 0))               # (kh, kw, Cin, Cout)
    sel = np.zeros((3, Wp, W), np.float32)
    for dx in range(3):
        sel[dx, np.arange(W) + dx, np.arange(W)] = 1.0
    t = jnp.einsum('kxw,dkio->dxiwo', jnp.asarray(sel, jnp.float32), w_taps)
    t = t.reshape(3, Wp * Cin, W * Cout).astype(compute_dtype)

    b_row = jnp.tile(bias.astype(jnp.float32), W).reshape(1, W * Cout)

    out_flat = pl.pallas_call(
        conv_relu_kernel,
        out_shape=jax.ShapeDtypeStruct((N, H, W * Cout), jnp.float32),
        grid_spec=pltpu.PrefetchScalarGridSpec(
            num_scalar_prefetch=0,
            grid=(n_steps,),
            in_specs=[
                # Padded slab for this batch block (whole image resident per step;
                # fine at these sizes -- see TODO for production strip-blocking).
                pl.BlockSpec((nb, Hp, Wp * Cin), lambda i: (i, 0, 0)),
                # Weights / bias resident across all steps.
                pl.BlockSpec((3, Wp * Cin, W * Cout), lambda i: (0, 0, 0)),
                pl.BlockSpec((1, W * Cout), lambda i: (0, 0)),
            ],
            out_specs=pl.BlockSpec((nb, H, W * Cout), lambda i: (i, 0, 0)),
        ),
        compiler_params=pltpu.CompilerParams(
            dimension_semantics=("parallel",),
            vmem_limit_bytes=32 * 1024 * 1024,
        ),
    )(x_flat, t, b_row)

    # Back to PyTorch NCHW convention.
    out = out_flat.reshape(N, H, W, Cout)
    return jnp.transpose(out, (0, 3, 1, 2))


if __name__ == "__main__":
    key = jax.random.PRNGKey(0)
    kx, kw, kb = jax.random.split(key, 3)

    N, Cin, H, W, Cout = 2, 4, 16, 16, 8
    fan_in = Cin * 3 * 3
    bound = 1.0 / np.sqrt(fan_in)   # nn.Conv2d default init range
    x = jax.random.normal(kx, (N, Cin, H, W), jnp.float32)
    weight = jax.random.uniform(kw, (Cout, Cin, 3, 3), jnp.float32,
                                minval=-bound, maxval=bound)
    bias = jax.random.uniform(kb, (Cout,), jnp.float32, minval=-bound, maxval=bound)

    out = jax.block_until_ready(conv_relu(x, weight, bias))
    assert out.shape == (N, Cout, H, W)

    # Reference with matching contraction numerics (bf16 operands, f32 accumulate).
    ref = jax.lax.conv_general_dilated(
        x.astype(jnp.bfloat16), weight.astype(jnp.bfloat16),
        window_strides=(1, 1), padding=((1, 1), (1, 1)),
        dimension_numbers=("NCHW", "OIHW", "NCHW"),
        preferred_element_type=jnp.float32)
    ref = jnp.maximum(ref + bias.reshape(1, Cout, 1, 1), 0.0)
    np.testing.assert_allclose(np.asarray(out), np.asarray(ref), rtol=1e-4, atol=1e-4)

    print("KERNEL_OK")
</pallas_src>

<mosaic_0001>
module attributes {stable_mosaic.version = 11 : i64} {
  func.func @conv_relu_kernel(%arg0: i32, %arg1: memref<1x18x72xbf16, #tpu.memory_space<vmem>>, %arg2: memref<3x72x128xbf16, #tpu.memory_space<vmem>>, %arg3: memref<1x128xf32, #tpu.memory_space<vmem>>, %arg4: memref<1x16x128xf32, #tpu.memory_space<vmem>>) attributes {dimension_semantics = [#tpu.dimension_semantics<parallel>], iteration_bounds = array<i64: 2>, scalar_prefetch = 0 : i64, scratch_operands = 0 : i64, tpu.core_type = #tpu.core_type<tc>, window_params = [{transform_indices = @transform_0, window_bounds = array<i64: 1, 18, 72>}, {pipeline_mode = #tpu.pipeline_mode<synchronous>, transform_indices = @transform_1, window_bounds = array<i64: 3, 72, 128>}, {pipeline_mode = #tpu.pipeline_mode<synchronous>, transform_indices = @transform_2, window_bounds = array<i64: 1, 128>}, {transform_indices = @transform_3, window_bounds = array<i64: 1, 16, 128>}]} {
    %c0 = arith.constant 0 : index
    %c0_0 = arith.constant 0 : index
    %c0_1 = arith.constant 0 : index
    %0 = vector.load %arg1[%c0, %c0_0, %c0_1] : memref<1x18x72xbf16, #tpu.memory_space<vmem>>, vector<1x16x72xbf16>
    %1 = vector.shape_cast %0 : vector<1x16x72xbf16> to vector<16x72xbf16>
    %c0_2 = arith.constant 0 : index
    %c0_3 = arith.constant 0 : index
    %c0_4 = arith.constant 0 : index
    %2 = vector.load %arg2[%c0_2, %c0_3, %c0_4] : memref<3x72x128xbf16, #tpu.memory_space<vmem>>, vector<1x72x128xbf16>
    %3 = vector.shape_cast %2 : vector<1x72x128xbf16> to vector<72x128xbf16>
    %cst = arith.constant dense<0.000000e+00> : vector<16x128xf32>
    %4 = tpu.matmul %1, %3, %cst {dimension_numbers = #tpu.dot_dimension_numbers<[1], [0], [0], [1], [0, 0, 1, 1], [], []>} : vector<16x72xbf16>, vector<72x128xbf16>, vector<16x128xf32> -> vector<16x128xf32>
    %c0_5 = arith.constant 0 : index
    %c1 = arith.constant 1 : index
    %c0_6 = arith.constant 0 : index
    %5 = vector.load %arg1[%c0_5, %c1, %c0_6] : memref<1x18x72xbf16, #tpu.memory_space<vmem>>, vector<1x16x72xbf16>
    %6 = vector.shape_cast %5 : vector<1x16x72xbf16> to vector<16x72xbf16>
    %c1_7 = arith.constant 1 : index
    %c0_8 = arith.constant 0 : index
    %c0_9 = arith.constant 0 : index
    %7 = vector.load %arg2[%c1_7, %c0_8, %c0_9] : memref<3x72x128xbf16, #tpu.memory_space<vmem>>, vector<1x72x128xbf16>
    %8 = vector.shape_cast %7 : vector<1x72x128xbf16> to vector<72x128xbf16>
    %cst_10 = arith.constant dense<0.000000e+00> : vector<16x128xf32>
    %9 = tpu.matmul %6, %8, %cst_10 {dimension_numbers = #tpu.dot_dimension_numbers<[1], [0], [0], [1], [0, 0, 1, 1], [], []>} : vector<16x72xbf16>, vector<72x128xbf16>, vector<16x128xf32> -> vector<16x128xf32>
    %10 = arith.addf %4, %9 : vector<16x128xf32>
    %c0_11 = arith.constant 0 : index
    %c2 = arith.constant 2 : index
    %c0_12 = arith.constant 0 : index
    %11 = vector.load %arg1[%c0_11, %c2, %c0_12] : memref<1x18x72xbf16, #tpu.memory_space<vmem>>, vector<1x16x72xbf16>
    %12 = vector.shape_cast %11 : vector<1x16x72xbf16> to vector<16x72xbf16>
    %c2_13 = arith.constant 2 : index
    %c0_14 = arith.constant 0 : index
    %c0_15 = arith.constant 0 : index
    %13 = vector.load %arg2[%c2_13, %c0_14, %c0_15] : memref<3x72x128xbf16, #tpu.memory_space<vmem>>, vector<1x72x128xbf16>
    %14 = vector.shape_cast %13 : vector<1x72x128xbf16> to vector<72x128xbf16>
    %cst_16 = arith.constant dense<0.000000e+00> : vector<16x128xf32>
    %15 = tpu.matmul %12, %14, %cst_16 {dimension_numbers = #tpu.dot_dimension_numbers<[1], [0], [0], [1], [0, 0, 1, 1], [], []>} : vector<16x72xbf16>, vector<72x128xbf16>, vector<16x128xf32> -> vector<16x128xf32>
    %16 = arith.addf %10, %15 : vector<16x128xf32>
    %c0_17 = arith.constant 0 : index
    %c0_18 = arith.constant 0 : index
    %17 = vector.load %arg3[%c0_17, %c0_18] : memref<1x128xf32, #tpu.memory_space<vmem>>, vector<1x128xf32>
    %18 = vector.broadcast %17 : vector<1x128xf32> to vector<16x128xf32>
    %19 = arith.addf %16, %18 : vector<16x128xf32>
    %cst_19 = arith.constant 0.000000e+00 : f32
    %20 = vector.broadcast %cst_19 : f32 to vector<16x128xf32>
    %21 = arith.maximumf %19, %20 : vector<16x128xf32>
    %22 = vector.shape_cast %21 : vector<16x128xf32> to vector<1x16x128xf32>
    %c0_20 = arith.constant 0 : index
    %c0_21 = arith.constant 0 : index
    %c0_22 = arith.constant 0 : index
    %23 = vector.load %arg4[%c0_20, %c0_21, %c0_22] : memref<1x16x128xf32, #tpu.memory_space<vmem>>, vector<1x16x128xf32>
    tpu.vector_store %arg4[%c0_20, %c0_21, %c0_22], %22 {strides = array<i32>} : memref<1x16x128xf32, #tpu.memory_space<vmem>>, vector<1x16x128xf32>,
    return
  }
  func.func @transform_0(%arg0: i32) -> (i32, i32, i32) {
    %c0_i32 = arith.constant 0 : i32
    %c0_i32_0 = arith.constant 0 : i32
    %c0_i32_1 = arith.constant 0 : i32
    return %arg0, %c0_i32, %c0_i32_0 : i32, i32, i32
  }
  func.func @transform_1(%arg0: i32) -> (i32, i32, i32) {
    %c0_i32 = arith.constant 0 : i32
    %c0_i32_0 = arith.constant 0 : i32
    %c0_i32_1 = arith.constant 0 : i32
    %c0_i32_2 = arith.constant 0 : i32
    return %c0_i32, %c0_i32_0, %c0_i32_1 : i32, i32, i32
  }
  func.func @transform_2(%arg0: i32) -> (i32, i32) {
    %c0_i32 = arith.constant 0 : i32
    %c0_i32_0 = arith.constant 0 : i32
    %c0_i32_1 = arith.constant 0 : i32
    return %c0_i32, %c0_i32_0 : i32, i32
  }
  func.func @transform_3(%arg0: i32) -> (i32, i32, i32) {
    %c0_i32 = arith.constant 0 : i32
    %c0_i32_0 = arith.constant 0 : i32
    %c0_i32_1 = arith.constant 0 : i32
    return %arg0, %c0_i32, %c0_i32_0 : i32, i32, i32
  }
}

</mosaic_0001>

<bundles_post_ra>
// kernel: tpu_custom_call.1
= control target key start
LH: loop header
LB: loop body
LE: loop exit
PB: predicated region body
PF: predicated region fallthrough
CT: control target
= control target key end

     0   :  { %8 = vsyncpa [#allocation3], 0  ;;  %s1041_s0 = inlined_call_operand.vmem [shape: bf16[2,18,72], index: 0, kind: input, shape index: {}]   ;;  %s1042_s1 = inlined_call_operand.hbm [shape: bf16[3,72,128], index: 1, kind: input, shape index: {}]   ;;  %s1043_s2 = inlined_call_operand.vmem [shape: f32[1,128], index: 2, kind: input, shape index: {}]   ;;  %s1044_s3 = inlined_call_operand.hbm [shape: f32[2,16,128], index: 3, kind: output, shape index: {}]  }
   0x1   :  { %9 = vsyncpa [#allocation4], 0 }
   0x2   :  { %11 = vsyncpa [#allocation4 + $0x1], 0  ;;  %s867_s12 = smov 0   ;;  %s869_s13 = smov 0  }
   0x3   :  { %s871_s14 = smov 0   ;;  %s873_s15 = smov 0  }
   0x4 LB: > { %s888_s16 = sadd.s32 4294967295, %s837_s15   ;;  %s572_s17 = sadd.s32 4294967294, %s837_s15   ;;  %s837_s15 = sphi %s873_s15, %s1060_s15   ;;  %s833_s14 = sphi %s871_s14, %s1059_s14   ;;  %s829_s13 = sphi %s869_s13, %s1058_s13   ;;  %s825_s12 = sphi %s867_s12, %s1057_s12  }
   0x5   : > { %s892_s18 = sadd.s32 1, %s837_s15   ;;  %s92_s19 = sadd.s32 1, %s833_s14 }
   0x6   : > { %s89_s20 = ssub.s32 %s837_s15, %s892_s18  ;;  %p102_p0 = scmp.ne.s32.totalorder %s833_s14, %s829_s13 }
   0x7   : > { %p90_p1 = scmp.eq.s32.totalorder %s89_s20, 0  ;;  %p103_p2 = scmp.eq.s32.totalorder %s888_s16, 1 }
   0x8   : > { %p108_p3 = scmp.ne.s32.totalorder %s829_s13, %s825_s12  ;;  %p109_p4 = scmp.eq.s32.totalorder %s572_s17, 1 }
   0x9   : > { %s903_s21 = scalar_select %p90_p1, %s833_s14, %s92_s19  }
   0xa   : > { %p905_p5 = por %p103_p2, %p102_p0  ;;  %p909_p6 = por %p109_p4, %p108_p3 }
   0xb   : > { %p573_p7 = scmp.ge.s32.totalorder %s837_s15, 1  ;;  %p116_p8 = scmp.lt.s32.totalorder %s837_s15, 3 }
   0xc   : > { %s1048_s22 = scalar_select %p905_p5, 1, 0 }
   0xd   : > { %s1049_s23 = scalar_select %p909_p6, 1, 0 }
   0xe   : > { %p1045_p9 = scmp.eq.s32.totalorder %s888_s16, 0  ;;  %p916_p10 = pnand %p573_p7, %p116_p8 }
   0xf   : > { %s839_s25 = smov [#allocation2]   ;;  %s743_s30 = scalar_lea.hbm %s1042_s1, 1728 }
  0x10   : > { %s1050_s24 = scalar_select %p916_p10, 1, 0 }
  0x11   : > { %s128_s26 = sshll.u32 %s839_s25, 4  ;;  %p675_p11 = pneg %p916_p10  ;;  %s129_s26 = int_to_ptr.vmem [resolvable:$true] %s128_s26 }
  0x12   : > { %p744_p13 = scmp.ne.s32.totalorder %s1042_s1, %s743_s30  ;;  %p750_p3 = scmp.lt.u32.totalorder %s743_s30, %s1042_s1 }
  0x13   : > { %p924_p12 = pnand %p1045_p9, %p675_p11 }
  0x15   : > { %p745_p0 = pneg %p924_p12 }
  0x17   : > { %p746_p1 = pnand %p745_p0, %p744_p13 }
  0x19   : > { %p747_p2 = pneg %p746_p1 }
  0x1b   : > { %p752_p4 = pnand %p750_p3, %p747_p2 }
  0x1d   : > { %755 = shalt.err (!%p752_p4)
}
  0x1e   : > { %s756_s8 = scalar_lea.vmem %s129_s26, 1728  ;;  %p764_p9 = scmp.lt.s32.totalorder %s129_s26, %s129_s26 }
  0x1f   : > { %p757_p7 = scmp.ne.s32.totalorder %s129_s26, %s756_s8  ;;  %p765_p6 = scmp.lt.s32.totalorder %s756_s8, %s756_s8 }
  0x21   : > { %p759_p8 = pnand %p757_p7, %p745_p0  ;;  %p766_p5 = por %p765_p6, %p764_p9 }
  0x23   : > { %p760_p11 = pneg %p759_p8 }
  0x25   : > { %p767_p10 = pnand %p766_p5, %p760_p11 }
  0x27   : > { %770 = shalt.err (!%p767_p10)
}
  0x28   : > { %s840_s9 = smov 64   ;;  %s841_s10 = smov 4  }
  0x29   : > { %678 = dma.hbm_to_vmem [thread:$0]  (!%p924_p12), %s1042_s1, 1728, %s129_s26, [#allocation3], %s840_s9, %s840_s9, %s841_s10  }
  0x2a   : > { %p1052_p13 = scmp.ne.s32.totalorder %s1050_s24, 0 }
  0x2b   : > { %p1053_p1 = scmp.eq.s32.totalorder (!%p1052_p13), %s888_s16, 0 }
  0x2c   : > { %155 = sbr.rel (%p1052_p13) target bundleno = 329 (0x149), region = 32 }
  0x33   : > { %816 = dma.done.wait (%p1053_p1), [#allocation3], 1728   ;;  %p1054_p0 = pmov %p1053_p1 }
  0x34   : > { %v842_v0 = vmov 0.0   ;;  %p179_p5 = scmp.lt.s32.totalorder %s888_s16, 1  ;;  %vm843_vm0 = vmmov 0   ;;  %v725_v1 = vld [vmem:[#allocation2 + $0x24] sm:$0xff]   ;;  %v727_v3 = vld [vmem:[#allocation2 + $0x2c] sm:$0xff]   ;;  %v729_v5 = vld [vmem:[#allocation2 + $0x34] sm:$0xff]  }
  0x35   : > { %818 = vsyncadd (%p1054_p0), [#allocation3], 4294965568  ;;  %626 = vmatprep.subr.bf16.mxu0 %v842_v0  ;;  %640 = vmatprep.subr.bf16.mxu1 %v842_v0  ;;  %v726_v2 = vld [vmem:[#allocation2] sm:$0xff]   ;;  %v728_v4 = vld [vmem:[#allocation2 + $0x8] sm:$0xff]   ;;  %vm259_vm1 = vcmask 1043456   ;;  %vm255_vm3 = vcmask 588800  }
  0x36   : > { %636 = vmatprep.mubr.msk.bf16.mxu0 %vm843_vm0, %v842_v0  ;;  %650 = vmatprep.mubr.msk.bf16.mxu1 %vm843_vm0, %v842_v0  ;;  %s180_s19 = scalar_select %p179_p5, %s888_s16, 1  ;;  %v730_v6 = vld [vmem:[#allocation2 + $0x10] sm:$0xff]   ;;  %v731_v7 = vld [vmem:[#allocation2 + $0x3c] sm:$0xff]   ;;  %v733_v8 = vld [vmem:[#allocation2 + $0x44] ss:$0 sps:$4 sm:$0xff]   ;;  %vm391_vm4 = vcmask 1046528  }
  0x37   : > { %627 = vmatpush3.bf16.msra.mxu0 %v725_v1  ;;  %641 = vmatpush3.bf16.msra.mxu1 %v726_v2  ;;  %v732_v11 = vld [vmem:[#allocation2 + $0x18] sm:$0xff]   ;;  %v734_v14 = vld [vmem:[#allocation2 + $0x20] ss:$0 sps:$4 sm:$0xff]   ;;  %vm215_vm2 = vsmask.f32 7424  ;;  %v261_v20 = vsel %vm259_vm1, %v733_v8, 0 }
  0x38   : > { %s668_s20 = smul.u32 12, %s180_s19  ;;  %628 = vmatprep.subr.bf16.mxu0 %v842_v0  ;;  %642 = vmatprep.subr.bf16.mxu1 %v842_v0  ;;  %v334_v21 = vsel %vm259_vm1, %v734_v14, 0  ;;  %v737_v24 = vld [vmem:[#allocation2 + $0x48] sm:$0xff]   ;;  %v738_v25 = vld [vmem:[#allocation2 + $0x50] sm:$0xff]   ;;  %v739_v26 = vld [vmem:[#allocation2 + $0x58] sm:$0xff]   ;;  %s176_s27 = sand.u32 1, %s829_s13  }
  0x39   : > { %v740_v28 = vld [vmem:[#allocation2 + $0x60] sm:$0xff]   ;;  %v741_v30 = vld [vmem:[#allocation2 + $0x68] ss:$0 sps:$4 sm:$0xff]   ;;  %s578_s28 = sshll.u32 %s176_s27, 4  ;;  %s607_s6 = sshll.u32 %s888_s16, 8 }
  0x3a   : > { %s963_s26 = scalar_lea.vmem %s1041_s0, %s668_s20  ;;  %v426_v33 = vsel %vm259_vm1, %v741_v30, 0  ;;  %v601_v46 = vld [vmem:[%s1043_s2] ss:$0 sm:$0xff]  ;;  %s178_s4 = scalar_lea.vmem [#allocation5], %s578_s28 }
  0x3b   : > { %629 = vmatpush3.bf16.msra.mxu0 %v727_v3  ;;  %643 = vmatpush3.bf16.msra.mxu1 %v728_v4  ;;  %v185_v9 = vld [vmem:[%s963_s26] sm:$0xf]  ;;  %v186_v10 = vld [vmem:[%s963_s26 + $0x4] sm:$0xf]  ;;  %s498_s5 = sshll.u32 %s178_s4, 4  ;;  %s998_s9 = scalar_lea.hbm %s1044_s3, %s607_s6  ;;  %s993_s5 = int_to_ptr.vmem [resolvable:$true] %s498_s5 }
  0x3c   : > { %630 = vmatprep.subr.bf16.mxu0 %v842_v0  ;;  %644 = vmatprep.subr.bf16.mxu1 %v842_v0  ;;  %v580_v12 = vcombine.low %v185_v9, %v186_v10  ;;  %v736_v13 = vld [vmem:[%s963_s26 + $0x8] ss:$0 sps:$4 sm:$0x11]   ;;  %v377_v27 = vld [vmem:[%s963_s26] sm:$0xe]  ;;  %s1000_s10 = scalar_lea.sflag [#allocation4], %s176_s27 }
  0x3d   : > { %v224_v17 = vshll.u32 %v736_v13, 16  ;;  %v594_v29 = vcombine.low %v377_v27, %v186_v10  ;;  %v393_v32 = vrot.slane %v736_v13, 1  ;;  %s771_s11 = scalar_lea.vmem %s993_s5, 256  ;;  %p1055_p9 = scmp.ne.s32.totalorder %s1048_s22, 0 }
  0x3e   : > { %v217_v15 = vshrl.u32 %v580_v12, 16  ;;  %v219_v16 = vshll.u32 %v580_v12, 16  ;;  %p772_p6 = scmp.ne.s32.totalorder %s993_s5, %s771_s11  ;;  %s844_s16 = smov [#allocation5]  }
  0x3f   : > { %631 = vmatpush3.bf16.msra.mxu0 %v729_v5  ;;  %645 = vmatpush3.bf16.msra.mxu1 %v730_v6  ;;  %v226_v19 = vrot.slane %v224_v17, 1  ;;  %v392_v31 = vrot.slane %v594_v29, 1  ;;  %s775_s17 = sshll.u32 %s844_s16, 4  ;;  %s776_s17 = int_to_ptr.vmem [resolvable:$false] %s775_s17 }
  0x40   : > { %632 = vmatprep.subr.bf16.mxu0 %v842_v0  ;;  %646 = vmatprep.subr.bf16.mxu1 %v842_v0  ;;  %v221_v18 = vrot.slane %v219_v16, 1  ;;  %p773_p10 = pnand %p772_p6, %p1055_p9  ;;  %s777_s19 = scalar_lea.vmem %s776_s17, 512 }
  0x41   : > { %v394_v34 = vsel %vm391_vm4, %v392_v31, %v393_v32  ;;  %p778_p2 = scmp.lt.s32.totalorder %s993_s5, %s776_s17  ;;  %p779_p3 = scmp.lt.s32.totalorder %s777_s19, %s771_s11 }
  0x42   : > { %v222_v22 = vor.u32 %v221_v18, %v217_v15  ;;  %p774_p12 = pneg %p773_p10 }
  0x43   : > { %633 = vmatpush3.bf16.msra.mxu0 %v731_v7  ;;  %647 = vmatpush3.bf16.msra.mxu1 %v732_v11  ;;  %p780_p4 = por %p779_p3, %p778_p2 }
  0x44   : > { %634 = vmatprep.subr.bf16.mxu0 %v842_v0  ;;  %648 = vmatprep.subr.bf16.mxu1 %v842_v0  ;;  %v227_v23 = vsel %vm215_vm2, %v222_v22, %v226_v19 }
  0x45   : > { %p781_p7 = pnand %p780_p4, %p774_p12 }
  0x47   : > { %635 = vmatpush3.bf16.msra.mxu0 %v261_v20  ;;  %649 = vmatpush3.bf16.msra.mxu1 %v334_v21 }
  0x48   : > { %654 = vmatprep.subr.bf16.mxu0 %v842_v0 }
  0x4a   : > { %637 = vmatmul.mubr.msk.bf16.vlgmr.msra.gmra.mrb[0].mxu0 %vm255_vm3, %v227_v23  ;;  %651 = vmatmul.mubr.msk.bf16.vlgmr.msra.gmra.mrb[0].mxu1 %vm255_vm3, %v580_v12 }
  0x4b   : > { %655 = vmatpush3.bf16.msra.mxu0 %v737_v24  ;;  %664 = vmatprep.mubr.msk.bf16.mxu0 %vm843_vm0, %v842_v0 }
  0x4c   : > { %656 = vmatprep.subr.bf16.mxu0 %v842_v0 }
  0x4f   : > { %657 = vmatpush3.bf16.msra.mxu0 %v738_v25 }
  0x50   : > { %658 = vmatprep.subr.bf16.mxu0 %v842_v0 }
  0x53   : > { %659 = vmatpush3.bf16.msra.mxu0 %v739_v26 }
  0x54   : > { %660 = vmatprep.subr.bf16.mxu0 %v842_v0 }
  0x57   : > { %661 = vmatpush3.bf16.msra.mxu0 %v740_v28 }
  0x58   : > { %662 = vmatprep.subr.bf16.mxu0 %v842_v0 }
  0x5b   : > { %663 = vmatpush3.bf16.msra.mxu0 %v426_v33 }
  0x5e   : > { %665 = vmatmul.mubr.msk.bf16.vlgmr.msra.gmra.mrb[4].mxu0 %vm255_vm3, %v394_v34 }
 0x11d   : > { %v297_v35 = vpop.f32.mrb[0].mxu0  ;;  %v370_v36 = vpop.f32.mrb[0].mxu1 }
 0x11e   : > { %v638_v37 = vpop.f32.mrb[1].mxu0  ;;  %v371_v38 = vadd.f32 %v370_v36, %v297_v35  ;;  %v652_v39 = vpop.f32.mrb[1].mxu1 }
 0x11f   : > { %v300_v40 = vpop.f32.mrb[2].mxu0  ;;  %v373_v41 = vpop.f32.mrb[2].mxu1 }
 0x120   : > { %v639_v42 = vpop.f32.mrb[3].mxu0  ;;  %v374_v43 = vadd.f32 %v373_v41, %v300_v40  ;;  %v653_v44 = vpop.f32.mrb[3].mxu1 }
 0x131   : > { %v462_v45 = vpop.f32.mrb[4].mxu0 }
 0x132   : > { %v469_v47 = vadd.f32 %v462_v45, %v371_v38  ;;  %v666_v48 = vpop.f32.mrb[5].mxu0 }
 0x133   : > { %v465_v49 = vpop.f32.mrb[6].mxu0 }
 0x134   : > { %v478_v50 = vadd.f32 %v601_v46, %v469_v47  ;;  %v470_v51 = vadd.f32 %v465_v49, %v374_v43  ;;  %v667_v52 = vpop.f32.mrb[7].mxu0 }
 0x136   : > { %v480_v53 = vmax.f32 %v478_v50, 0.0  ;;  %v479_v54 = vadd.f32 %v601_v46, %v470_v51 }
 0x138   : > { %482 = vst [vmem:[%s178_s4] sm:$0xff] %v480_v53  ;;  %v481_v55 = vmax.f32 %v479_v54, 0.0 }
 0x13a   : > { %483 = vst [vmem:[%s178_s4 + $0x8] sm:$0xff] %v481_v55 }
 0x13b   : > { %784 = shalt.err (!%p781_p7)
}
 0x13c   : > { %s785_s20 = scalar_lea.hbm %s998_s9, 256  ;;  %s789_s26 = scalar_lea.hbm %s1044_s3, 512 }
 0x13d   : > { %p786_p8 = scmp.ne.s32.totalorder %s998_s9, %s785_s20  ;;  %p790_p1 = scmp.lt.u32.totalorder %s998_s9, %s1044_s3 }
 0x13e   : > { %p791_p0 = scmp.lt.u32.totalorder %s789_s26, %s785_s20  ;;  %p793_p6 = scmp.lt.u32.totalorder %s785_s20, %s998_s9 }
 0x13f   : > { %p787_p11 = pnand %p786_p8, %p1055_p9 }
 0x140   : > { %p792_p5 = por %p791_p0, %p790_p1 }
 0x141   : > { %p788_p13 = pneg %p787_p11 }
 0x142   : > { %p794_p10 = por %p793_p6, %p792_p5 }
 0x144   : > { %p795_p12 = pnand %p794_p10, %p788_p13 }
 0x146   : > { %798 = shalt.err (!%p795_p12)
}
 0x147   : > { %s845_s29 = smov 128   ;;  %s846_s30 = smov 8  }
 0x148   : > { %673 = dma.vmem_to_hbm [thread:$0]  (%p1055_p9), %s993_s5, 256, %s998_s9, %s1000_s10, %s845_s29, %s845_s29, %s846_s30  }
 0x149 PF: > { %p685_p2 = scmp.ge.s32.totalorder %s837_s15, 2  ;;  %s513_s4 = sand.u32 1, %s825_s12  }
 0x14a   : > { %p1056_p3 = scmp.ne.s32.totalorder %s1049_s23, 0  ;;  %s514_s6 = scalar_lea.sflag [#allocation4], %s513_s4 }
 0x14c   : > { %p680_p4 = pnand %p685_p2, %p1056_p3 }
 0x14e   : > { %820 = dma.done.wait (!%p680_p4), %s514_s6, 256  }
 0x14f   : > { %822 = vsyncadd (!%p680_p4), %s514_s6, 4294967040  ;;  %p14_p7 = scmp.ge.s32.totalorder %s892_s18, 4   ;;  %s1057_s12 = smov %s829_s13 }
 0x150   : > { %s1058_s13 = smov %s833_s14  ;;  %s1059_s14 = smov %s903_s21 }
 0x151   : > { %s1060_s15 = smov %s892_s18  ;;  %16 = sbr.rel (!%p14_p7) target bundleno = 4 (0x4), region = 74 }
 0x158   :  { %519 = vsyncpa [#allocation3], 1 }
 0x159   :  { %521 = vsyncpa [#allocation3 + $0x1], 1 }
 0x15a   :  { %522 = vsyncpa [#allocation4], 1 }
 0x15b   :  { %524 = vsyncpa [#allocation4 + $0x1], 1 }

</bundles_post_ra>
